<compile_context>
chip_gen: v5e
topology: v5e:2x2
jax: 0.10.0
libtpu: 0.0.40
codegen_flags: <defaults>
</compile_context>

<pallas_src>
import jax
import jax.numpy as jnp
from jax.experimental import pallas as pl
from jax.experimental.pallas import tpu as pltpu


def _round_up(x: int, m: int) -> int:
    return ((x + m - 1) // m) * m


def _pad2(a, rows, cols):
    pr, pc = rows - a.shape[0], cols - a.shape[1]
    if pr or pc:
        a = jnp.pad(a, ((0, pr), (0, pc)))
    return a


def _ffn_kernel(x_ref, w1_ref, b1_ref, w3_ref, b3_ref, w2_ref, b2_ref,
                o_ref, acc_ref):
    """One (row-tile, F-tile) step of the fused SwiGLU FFN.

    x_ref : (tm, Hp)   input row tile (resident across the F axis)
    w1_ref: (Hp, tf)   gate projection weight column tile
    b1_ref: (1, tf)    gate projection bias tile
    w3_ref: (Hp, tf)   up projection weight column tile
    b3_ref: (1, tf)    up projection bias tile
    w2_ref: (tf, Hp)   down projection weight row tile
    b2_ref: (1, Hp)    down projection bias
    o_ref : (tm, Hp)   output row tile (written once, at the last F step)
    acc_ref: (tm, Hp)  f32 accumulator scratch
    """
    kf = pl.program_id(1)

    @pl.when(kf == 0)
    def _init():
        acc_ref[...] = jnp.zeros_like(acc_ref)

    x = x_ref[...]

    # F1 slice + SiLU (mode 'la'), f32 accumulation on the MXU.
    h1 = jnp.dot(x, w1_ref[...], preferred_element_type=jnp.float32) + b1_ref[...]
    h1 = h1 * jax.nn.sigmoid(h1)  # SiLU / swish (sigmoid -> EUP)

    # F3 slice (mode 'l').
    h3 = jnp.dot(x, w3_ref[...], preferred_element_type=jnp.float32) + b3_ref[...]

    # Gate * up, then partial down-projection accumulated over F tiles.
    h = (h1 * h3).astype(w2_ref.dtype)
    acc_ref[...] += jnp.dot(h, w2_ref[...], preferred_element_type=jnp.float32)

    @pl.when(kf == pl.num_programs(1) - 1)
    def _finalize():
        # F2 bias added once; dropout with drop_prob=0.0 is identity.
        o_ref[...] = (acc_ref[...] + b2_ref[...]).astype(o_ref.dtype)


def feed_forward(x, w1, b1, w3, b3, w2, b2, *, tm=256, tf=512,
                 vmem_limit_bytes=64 * 1024 * 1024):
    """x: (batch, seq, hidden). Weights in (in, out) layout, biases (1, out)."""
    B, S, H = x.shape
    F = w1.shape[1]
    M = B * S
    x2d = x.reshape(M, H)

    # --- Pad to TPU-friendly sizes (zero padding preserves the math here). ---
    Hp = _round_up(H, 128)          # lane dim of x / output, contraction of F1/F3
    Fp = _round_up(F, 128)          # lane dim of h, contraction of F2
    tm = min(tm, _round_up(M, 8))   # row tile: multiple of 8, never > needed
    tf = min(tf, Fp)                # F tile: multiple of 128
    Mp = _round_up(M, tm)
    Fp = _round_up(Fp, tf)

    x_p = _pad2(x2d, Mp, Hp)
    w1_p = _pad2(w1, Hp, Fp)
    b1_p = _pad2(b1, 1, Fp)
    w3_p = _pad2(w3, Hp, Fp)
    b3_p = _pad2(b3, 1, Fp)
    w2_p = _pad2(w2, Fp, Hp)
    b2_p = _pad2(b2, 1, Hp)

    grid = (Mp // tm, Fp // tf)

    # Advisory cost estimate: 3 matmuls of 2*M*H*F flops, sigmoid is M*F EUP ops.
    cost = pl.CostEstimate(
        flops=6 * M * H * F,
        transcendentals=M * F,
        bytes_accessed=(x2d.nbytes + w1.nbytes + b1.nbytes + w3.nbytes
                        + b3.nbytes + w2.nbytes + b2.nbytes
                        + M * H * x.dtype.itemsize),
    )

    out2d = pl.pallas_call(
        _ffn_kernel,
        out_shape=jax.ShapeDtypeStruct((Mp, Hp), x.dtype),
        grid=grid,
        in_specs=[
            pl.BlockSpec((tm, Hp), lambda i, kf: (i, 0)),    # x row tile
            pl.BlockSpec((Hp, tf), lambda i, kf: (0, kf)),   # w1 column tile
            pl.BlockSpec((1, tf), lambda i, kf: (0, kf)),    # b1 tile
            pl.BlockSpec((Hp, tf), lambda i, kf: (0, kf)),   # w3 column tile
            pl.BlockSpec((1, tf), lambda i, kf: (0, kf)),    # b3 tile
            pl.BlockSpec((tf, Hp), lambda i, kf: (kf, 0)),   # w2 row tile
            pl.BlockSpec((1, Hp), lambda i, kf: (0, 0)),     # b2
        ],
        out_specs=pl.BlockSpec((tm, Hp), lambda i, kf: (i, 0)),
        scratch_shapes=[pltpu.VMEM((tm, Hp), jnp.float32)],  # f32 accumulator
        compiler_params=pltpu.CompilerParams(
            dimension_semantics=("parallel", "arbitrary"),
            vmem_limit_bytes=vmem_limit_bytes,
        ),
        cost_estimate=cost,
    )(x_p, w1_p, b1_p, w3_p, b3_p, w2_p, b2_p)

    return out2d[:M, :H].reshape(B, S, H)


def feed_forward_ref(x, w1, b1, w3, b3, w2, b2):
    """Pure-JAX reference for correctness checking."""
    h1 = x @ w1 + b1[0]
    h1 = h1 * jax.nn.sigmoid(h1)
    h3 = x @ w3 + b3[0]
    return (h1 * h3) @ w2 + b2[0]


# TODO(synk): training-mode dropout (drop_prob > 0) is not implemented; the
# module's default drop_prob=0.0 / eval mode makes F2's dropout an identity.


if __name__ == "__main__":
    # Small shapes consistent with the module's forward: (batch, seq, hidden).
    batch, seq, hidden, ff_hidden = 2, 8, 32, 64

    key = jax.random.PRNGKey(0)
    kx, k1, kb1, k3, kb3, k2, kb2 = jax.random.split(key, 7)

    x = jax.random.normal(kx, (batch, seq, hidden), dtype=jnp.float32)

    # Parameters stored directly in (in, out) layout for the kernel.
    w1 = jax.random.normal(k1, (hidden, ff_hidden), dtype=jnp.float32) * (hidden ** -0.5)
    b1 = jax.random.normal(kb1, (1, ff_hidden), dtype=jnp.float32) * 0.01
    w3 = jax.random.normal(k3, (hidden, ff_hidden), dtype=jnp.float32) * (hidden ** -0.5)
    b3 = jax.random.normal(kb3, (1, ff_hidden), dtype=jnp.float32) * 0.01
    w2 = jax.random.normal(k2, (ff_hidden, hidden), dtype=jnp.float32) * (ff_hidden ** -0.5)
    b2 = jax.random.normal(kb2, (1, hidden), dtype=jnp.float32) * 0.01

    y = feed_forward(x, w1, b1, w3, b3, w2, b2)
    y = jax.block_until_ready(y)

    y_ref = feed_forward_ref(x, w1, b1, w3, b3, w2, b2)
    assert y.shape == (batch, seq, hidden)
    assert jnp.allclose(y, y_ref, atol=1e-4, rtol=1e-4), "mismatch vs reference"

    print("KERNEL_OK")
</pallas_src>

<mosaic_0001>
module attributes {stable_mosaic.version = 11 : i64} {
  func.func @_ffn_kernel(%arg0: i32, %arg1: i32, %arg2: memref<16x128xf32, #tpu.memory_space<vmem>>, %arg3: memref<128x128xf32, #tpu.memory_space<vmem>>, %arg4: memref<1x128xf32, #tpu.memory_space<vmem>>, %arg5: memref<128x128xf32, #tpu.memory_space<vmem>>, %arg6: memref<1x128xf32, #tpu.memory_space<vmem>>, %arg7: memref<128x128xf32, #tpu.memory_space<vmem>>, %arg8: memref<1x128xf32, #tpu.memory_space<vmem>>, %arg9: memref<16x128xf32, #tpu.memory_space<vmem>>, %arg10: memref<16x128xf32, #tpu.memory_space<vmem>>) attributes {dimension_semantics = [#tpu.dimension_semantics<parallel>, #tpu.dimension_semantics<arbitrary>], iteration_bounds = array<i64: 1, 1>, scalar_prefetch = 0 : i64, scratch_operands = 1 : i64, tpu.core_type = #tpu.core_type<tc>, window_params = [{transform_indices = @transform_0, window_bounds = array<i64: 16, 128>}, {transform_indices = @transform_1, window_bounds = array<i64: 128, 128>}, {transform_indices = @transform_2, window_bounds = array<i64: 1, 128>}, {transform_indices = @transform_3, window_bounds = array<i64: 128, 128>}, {transform_indices = @transform_4, window_bounds = array<i64: 1, 128>}, {transform_indices = @transform_5, window_bounds = array<i64: 128, 128>}, {pipeline_mode = #tpu.pipeline_mode<synchronous>, transform_indices = @transform_6, window_bounds = array<i64: 1, 128>}, {transform_indices = @transform_7, window_bounds = array<i64: 16, 128>}]} {
    %c0_i32 = arith.constant 0 : i32
    %0 = arith.cmpi eq, %arg1, %c0_i32 : i32
    %1 = arith.extui %0 : i1 to i32
    %c0_i32_0 = arith.constant 0 : i32
    %2 = arith.cmpi ne, %1, %c0_i32_0 : i32
    scf.if %2 {
      %cst_21 = arith.constant 0.000000e+00 : f32
      %29 = vector.broadcast %cst_21 : f32 to vector<16x128xf32>
      %c0_22 = arith.constant 0 : index
      %c0_23 = arith.constant 0 : index
      %30 = vector.load %arg10[%c0_22, %c0_23] : memref<16x128xf32, #tpu.memory_space<vmem>>, vector<16x128xf32>
      tpu.vector_store %arg10[%c0_22, %c0_23], %29 {strides = array<i32>} : memref<16x128xf32, #tpu.memory_space<vmem>>, vector<16x128xf32>,
    } else {
    }
    %c0 = arith.constant 0 : index
    %c0_1 = arith.constant 0 : index
    %3 = vector.load %arg2[%c0, %c0_1] : memref<16x128xf32, #tpu.memory_space<vmem>>, vector<16x128xf32>
    %c0_2 = arith.constant 0 : index
    %c0_3 = arith.constant 0 : index
    %4 = vector.load %arg3[%c0_2, %c0_3] : memref<128x128xf32, #tpu.memory_space<vmem>>, vector<128x128xf32>
    %cst = arith.constant dense<0.000000e+00> : vector<16x128xf32>
    %5 = tpu.matmul %3, %4, %cst {dimension_numbers = #tpu.dot_dimension_numbers<[1], [0], [0], [1], [0, 0, 1, 1], [], []>} : vector<16x128xf32>, vector<128x128xf32>, vector<16x128xf32> -> vector<16x128xf32>
    %c0_4 = arith.constant 0 : index
    %c0_5 = arith.constant 0 : index
    %6 = vector.load %arg4[%c0_4, %c0_5] : memref<1x128xf32, #tpu.memory_space<vmem>>, vector<1x128xf32>
    %7 = vector.broadcast %6 : vector<1x128xf32> to vector<16x128xf32>
    %8 = arith.addf %5, %7 : vector<16x128xf32>
    %9 = arith.negf %8 : vector<16x128xf32>
    %10 = math.exp %9 : vector<16x128xf32>
    %cst_6 = arith.constant 1.000000e+00 : f32
    %11 = vector.broadcast %cst_6 : f32 to vector<16x128xf32>
    %12 = arith.addf %11, %10 : vector<16x128xf32>
    %13 = arith.divf %11, %12 : vector<16x128xf32>
    %14 = arith.mulf %8, %13 : vector<16x128xf32>
    %c0_7 = arith.constant 0 : index
    %c0_8 = arith.constant 0 : index
    %15 = vector.load %arg5[%c0_7, %c0_8] : memref<128x128xf32, #tpu.memory_space<vmem>>, vector<128x128xf32>
    %cst_9 = arith.constant dense<0.000000e+00> : vector<16x128xf32>
    %16 = tpu.matmul %3, %15, %cst_9 {dimension_numbers = #tpu.dot_dimension_numbers<[1], [0], [0], [1], [0, 0, 1, 1], [], []>} : vector<16x128xf32>, vector<128x128xf32>, vector<16x128xf32> -> vector<16x128xf32>
    %c0_10 = arith.constant 0 : index
    %c0_11 = arith.constant 0 : index
    %17 = vector.load %arg6[%c0_10, %c0_11] : memref<1x128xf32, #tpu.memory_space<vmem>>, vector<1x128xf32>
    %18 = vector.broadcast %17 : vector<1x128xf32> to vector<16x128xf32>
    %19 = arith.addf %16, %18 : vector<16x128xf32>
    %20 = arith.mulf %14, %19 : vector<16x128xf32>
    %c0_12 = arith.constant 0 : index
    %c0_13 = arith.constant 0 : index
    %21 = vector.load %arg10[%c0_12, %c0_13] : memref<16x128xf32, #tpu.memory_space<vmem>>, vector<16x128xf32>
    %c0_14 = arith.constant 0 : index
    %c0_15 = arith.constant 0 : index
    %22 = vector.load %arg7[%c0_14, %c0_15] : memref<128x128xf32, #tpu.memory_space<vmem>>, vector<128x128xf32>
    %cst_16 = arith.constant dense<0.000000e+00> : vector<16x128xf32>
    %23 = tpu.matmul %20, %22, %cst_16 {dimension_numbers = #tpu.dot_dimension_numbers<[1], [0], [0], [1], [0, 0, 1, 1], [], []>} : vector<16x128xf32>, vector<128x128xf32>, vector<16x128xf32> -> vector<16x128xf32>
    %24 = arith.addf %21, %23 : vector<16x128xf32>
    %c0_17 = arith.constant 0 : index
    %c0_18 = arith.constant 0 : index
    %25 = vector.load %arg10[%c0_17, %c0_18] : memref<16x128xf32, #tpu.memory_space<vmem>>, vector<16x128xf32>
    tpu.vector_store %arg10[%c0_17, %c0_18], %24 {strides = array<i32>} : memref<16x128xf32, #tpu.memory_space<vmem>>, vector<16x128xf32>,
    %c0_i32_19 = arith.constant 0 : i32
    %26 = arith.cmpi eq, %arg1, %c0_i32_19 : i32
    %27 = arith.extui %26 : i1 to i32
    %c0_i32_20 = arith.constant 0 : i32
    %28 = arith.cmpi ne, %27, %c0_i32_20 : i32
    scf.if %28 {
      %c0_21 = arith.constant 0 : index
      %c0_22 = arith.constant 0 : index
      %29 = vector.load %arg10[%c0_21, %c0_22] : memref<16x128xf32, #tpu.memory_space<vmem>>, vector<16x128xf32>
      %c0_23 = arith.constant 0 : index
      %c0_24 = arith.constant 0 : index
      %30 = vector.load %arg8[%c0_23, %c0_24] : memref<1x128xf32, #tpu.memory_space<vmem>>, vector<1x128xf32>
      %31 = vector.broadcast %30 : vector<1x128xf32> to vector<16x128xf32>
      %32 = arith.addf %29, %31 : vector<16x128xf32>
      %c0_25 = arith.constant 0 : index
      %c0_26 = arith.constant 0 : index
      %33 = vector.load %arg9[%c0_25, %c0_26] : memref<16x128xf32, #tpu.memory_space<vmem>>, vector<16x128xf32>
      tpu.vector_store %arg9[%c0_25, %c0_26], %32 {strides = array<i32>} : memref<16x128xf32, #tpu.memory_space<vmem>>, vector<16x128xf32>,
    } else {
    }
    return
  }
  func.func @transform_0(%arg0: i32, %arg1: i32) -> (i32, i32) {
    %c0_i32 = arith.constant 0 : i32
    %c0_i32_0 = arith.constant 0 : i32
    return %arg0, %c0_i32 : i32, i32
  }
  func.func @transform_1(%arg0: i32, %arg1: i32) -> (i32, i32) {
    %c0_i32 = arith.constant 0 : i32
    %c0_i32_0 = arith.constant 0 : i32
    return %c0_i32, %arg1 : i32, i32
  }
  func.func @transform_2(%arg0: i32, %arg1: i32) -> (i32, i32) {
    %c0_i32 = arith.constant 0 : i32
    %c0_i32_0 = arith.constant 0 : i32
    return %c0_i32, %arg1 : i32, i32
  }
  func.func @transform_3(%arg0: i32, %arg1: i32) -> (i32, i32) {
    %c0_i32 = arith.constant 0 : i32
    %c0_i32_0 = arith.constant 0 : i32
    return %c0_i32, %arg1 : i32, i32
  }
  func.func @transform_4(%arg0: i32, %arg1: i32) -> (i32, i32) {
    %c0_i32 = arith.constant 0 : i32
    %c0_i32_0 = arith.constant 0 : i32
    return %c0_i32, %arg1 : i32, i32
  }
  func.func @transform_5(%arg0: i32, %arg1: i32) -> (i32, i32) {
    %c0_i32 = arith.constant 0 : i32
    %c0_i32_0 = arith.constant 0 : i32
    return %arg1, %c0_i32 : i32, i32
  }
  func.func @transform_6(%arg0: i32, %arg1: i32) -> (i32, i32) {
    %c0_i32 = arith.constant 0 : i32
    %c0_i32_0 = arith.constant 0 : i32
    %c0_i32_1 = arith.constant 0 : i32
    return %c0_i32, %c0_i32_0 : i32, i32
  }
  func.func @transform_7(%arg0: i32, %arg1: i32) -> (i32, i32) {
    %c0_i32 = arith.constant 0 : i32
    %c0_i32_0 = arith.constant 0 : i32
    return %arg0, %c0_i32 : i32, i32
  }
}

</mosaic_0001>

<bundles_post_ra>
// kernel: tpu_custom_call.1
= control target key start
LH: loop header
LB: loop body
LE: loop exit
PB: predicated region body
PF: predicated region fallthrough
CT: control target
= control target key end

     0   :  { %12 = vsyncpa [#allocation4], 0  ;;  %s555_s0 = inlined_call_operand.hbm [shape: f32[16,128], index: 0, kind: input, shape index: {}]   ;;  %s556_s1 = inlined_call_operand.hbm [shape: f32[128,128], index: 1, kind: input, shape index: {}]   ;;  %s557_s2 = inlined_call_operand.vmem [shape: f32[1,128], index: 2, kind: input, shape index: {}]   ;;  %s558_s3 = inlined_call_operand.hbm [shape: f32[128,128], index: 3, kind: input, shape index: {}]   ;;  %s559_s4 = inlined_call_operand.vmem [shape: f32[1,128], index: 4, kind: input, shape index: {}]   ;;  %s560_s5 = inlined_call_operand.hbm [shape: f32[128,128], index: 5, kind: input, shape index: {}]   ;;  %s561_s6 = inlined_call_operand.vmem [shape: f32[1,128], index: 6, kind: input, shape index: {}]   ;;  %s562_s7 = inlined_call_operand.hbm [shape: f32[16,128], index: 7, kind: output, shape index: {}]  }
   0x1   :  { %13 = vsyncpa [#allocation7], 0 }
   0x2   :  { %14 = vsyncpa [#allocation10], 0 }
   0x3   :  { %15 = vsyncpa [#allocation5], 0  ;;  %s33_s26 = sshll.u32 %s556_s1, 4  ;;  %s469_s27 = smov [#allocation6]   ;;  %s34_s26 = int_to_ptr.hbm [resolvable:$true] %s33_s26 }
   0x4   :  { %s35_s28 = sshll.u32 %s469_s27, 4  ;;  %s20_s8 = sshll.u32 %s555_s0, 4  ;;  %s36_s28 = int_to_ptr.vmem [resolvable:$true] %s35_s28  ;;  %s21_s8 = int_to_ptr.hbm [resolvable:$true] %s20_s8 }
   0x5   :  { %s470_s9 = smov 128   ;;  %s471_s10 = smov 8  }
   0x6   :  { %41 = dma.hbm_to_vmem [thread:$0]  %s34_s26, 2048, %s36_s28, [#allocation7], %s470_s9, %s470_s9, %s471_s10  }
   0x7   :  { %s472_s11 = smov [#allocation3]   ;;  %s48_s1 = sshll.u32 %s558_s3, 4  ;;  %s49_s1 = int_to_ptr.hbm [resolvable:$true] %s48_s1 }
   0x8   :  { %s22_s12 = sshll.u32 %s472_s11, 4  ;;  %s63_s16 = sshll.u32 %s560_s5, 4  ;;  %s23_s12 = int_to_ptr.vmem [resolvable:$true] %s22_s12  ;;  %s64_s16 = int_to_ptr.hbm [resolvable:$true] %s63_s16 }
   0x9   :  { %28 = dma.hbm_to_vmem [thread:$0]  %s21_s8, 256, %s23_s12, [#allocation4], %s470_s9, %s470_s9, %s471_s10  }
   0xa   :  { %s473_s17 = smov [#allocation8]   ;;  %s474_s19 = smov [#allocation9]  }
   0xb   :  { %s50_s18 = sshll.u32 %s473_s17, 4  ;;  %s65_s3 = sshll.u32 %s474_s19, 4  ;;  %s51_s18 = int_to_ptr.vmem [resolvable:$true] %s50_s18  ;;  %s66_s3 = int_to_ptr.vmem [resolvable:$true] %s65_s3 }
   0xc   :  { %56 = dma.hbm_to_vmem [thread:$0]  %s49_s1, 2048, %s51_s18, [#allocation7], %s470_s9, %s470_s9, %s471_s10  }
   0xd   :  { %71 = dma.hbm_to_vmem [thread:$0]  %s64_s16, 2048, %s66_s3, [#allocation10], %s470_s9, %s470_s9, %s471_s10  }
   0xe   :  { %461 = dma.done.wait [#allocation4], 256  }
   0xf   :  { %462 = vsyncadd [#allocation4], 4294967040 }
  0x10   :  { %463 = dma.done.wait [#allocation7], 4096  }
  0x11   :  { %464 = vsyncadd [#allocation7], 4294963200 }
  0x12   :  { %465 = dma.done.wait [#allocation10], 2048  }
  0x13   :  { %466 = vsyncadd [#allocation10], 4294965248  ;;  %v113_v0 = vld [vmem:[#allocation6 + $0x78] sm:$0xff]  ;;  %v112_v1 = vld [vmem:[#allocation6 + $0x70] sm:$0xff]  ;;  %s475_s23 = smov [#allocation11]   ;;  %s290_s27 = sshll.u32 %s562_s7, 4  ;;  %s291_s27 = int_to_ptr.hbm [resolvable:$true] %s290_s27 }
  0x14   :  { %118 = vmatpush.msra.mxu0 %v113_v0  ;;  %307 = vmatpush.msra.mxu3 %v113_v0  ;;  %v111_v2 = vld [vmem:[#allocation6 + $0x68] sm:$0xff]  ;;  %v110_v3 = vld [vmem:[#allocation6 + $0x60] sm:$0xff]  ;;  %v196_v4 = vld [vmem:[#allocation8 + $0x78] sm:$0xff]  ;;  %s288_s24 = sshll.u32 %s475_s23, 4  ;;  %s289_s24 = int_to_ptr.vmem [resolvable:$true] %s288_s24 }
  0x15   :  { %v195_v5 = vld [vmem:[#allocation8 + $0x70] sm:$0xff]  ;;  %v109_v6 = vld [vmem:[#allocation6 + $0x58] sm:$0xff]  ;;  %201 = vmatpush.msra.mxu1 %v196_v4  ;;  %v194_v7 = vld [vmem:[#allocation8 + $0x68] sm:$0xff] }
  0x16   :  { %119 = vmatpush.msra.mxu0 %v112_v1  ;;  %308 = vmatpush.msra.mxu3 %v112_v1  ;;  %v108_v8 = vld [vmem:[#allocation6 + $0x50] sm:$0xff]  ;;  %v193_v9 = vld [vmem:[#allocation8 + $0x60] sm:$0xff]  ;;  %v107_v10 = vld [vmem:[#allocation6 + $0x48] sm:$0xff] }
  0x17   :  { %202 = vmatpush.msra.mxu1 %v195_v5  ;;  %v192_v11 = vld [vmem:[#allocation8 + $0x58] sm:$0xff]  ;;  %v106_v12 = vld [vmem:[#allocation6 + $0x40] sm:$0xff]  ;;  %v191_v13 = vld [vmem:[#allocation8 + $0x50] sm:$0xff] }
  0x18   :  { %120 = vmatpush.msra.mxu0 %v111_v2  ;;  %309 = vmatpush.msra.mxu3 %v111_v2  ;;  %v105_v14 = vld [vmem:[#allocation6 + $0x38] sm:$0xff]  ;;  %v190_v15 = vld [vmem:[#allocation8 + $0x48] sm:$0xff]  ;;  %v104_v16 = vld [vmem:[#allocation6 + $0x30] sm:$0xff] }
  0x19   :  { %203 = vmatpush.msra.mxu1 %v194_v7  ;;  %v189_v17 = vld [vmem:[#allocation8 + $0x40] sm:$0xff]  ;;  %v103_v18 = vld [vmem:[#allocation6 + $0x28] sm:$0xff]  ;;  %v188_v19 = vld [vmem:[#allocation8 + $0x38] sm:$0xff] }
  0x1a   :  { %121 = vmatpush.msra.mxu0 %v110_v3  ;;  %310 = vmatpush.msra.mxu3 %v110_v3  ;;  %v102_v20 = vld [vmem:[#allocation6 + $0x20] sm:$0xff]  ;;  %v187_v21 = vld [vmem:[#allocation8 + $0x30] sm:$0xff]  ;;  %v101_v22 = vld [vmem:[#allocation6 + $0x18] sm:$0xff] }
  0x1b   :  { %204 = vmatpush.msra.mxu1 %v193_v9  ;;  %v186_v23 = vld [vmem:[#allocation8 + $0x28] sm:$0xff]  ;;  %v100_v24 = vld [vmem:[#allocation6 + $0x10] sm:$0xff]  ;;  %v185_v25 = vld [vmem:[#allocation8 + $0x20] sm:$0xff] }
  0x1c   :  { %122 = vmatpush.msra.mxu0 %v109_v6  ;;  %311 = vmatpush.msra.mxu3 %v109_v6  ;;  %v99_v26 = vld [vmem:[#allocation6 + $0x8] sm:$0xff]  ;;  %v184_v27 = vld [vmem:[#allocation8 + $0x18] sm:$0xff]  ;;  %v98_v28 = vld [vmem:[#allocation6] sm:$0xff] }
  0x1d   :  { %205 = vmatpush.msra.mxu1 %v192_v11  ;;  %v96_v29 = vld [vmem:[#allocation3] sm:$0xff]  ;;  %v97_v30 = vld [vmem:[#allocation3 + $0x8] sm:$0xff]  ;;  %v182_v32 = vld [vmem:[#allocation8 + $0x8] sm:$0xff] }
  0x1e   :  { %123 = vmatpush.msra.mxu0 %v108_v8  ;;  %312 = vmatpush.msra.mxu3 %v108_v8  ;;  %v183_v31 = vld [vmem:[#allocation8 + $0x10] sm:$0xff]  ;;  %v181_v33 = vld [vmem:[#allocation8] sm:$0xff]  ;;  %v243_v34 = vld [vmem:[#allocation9 + $0x78] sm:$0xff] }
  0x1f   :  { %206 = vmatpush.msra.mxu1 %v191_v13  ;;  %244 = vmatpush.msra.mxu2 %v243_v34  ;;  %v242_v35 = vld [vmem:[#allocation9 + $0x70] sm:$0xff]  ;;  %v241_v36 = vld [vmem:[#allocation9 + $0x68] sm:$0xff]  ;;  %v240_v37 = vld [vmem:[#allocation9 + $0x60] sm:$0xff] }
  0x20   :  { %124 = vmatpush.msra.mxu0 %v107_v10  ;;  %313 = vmatpush.msra.mxu3 %v107_v10  ;;  %v239_v38 = vld [vmem:[#allocation9 + $0x58] sm:$0xff]  ;;  %v238_v39 = vld [vmem:[#allocation9 + $0x50] sm:$0xff]  ;;  %v237_v40 = vld [vmem:[#allocation9 + $0x48] sm:$0xff] }
  0x21   :  { %207 = vmatpush.msra.mxu1 %v190_v15  ;;  %245 = vmatpush.msra.mxu2 %v242_v35  ;;  %v236_v41 = vld [vmem:[#allocation9 + $0x40] sm:$0xff]  ;;  %v235_v42 = vld [vmem:[#allocation9 + $0x38] sm:$0xff]  ;;  %v234_v43 = vld [vmem:[#allocation9 + $0x30] sm:$0xff] }
  0x22   :  { %125 = vmatpush.msra.mxu0 %v106_v12  ;;  %314 = vmatpush.msra.mxu3 %v106_v12  ;;  %v233_v44 = vld [vmem:[#allocation9 + $0x28] sm:$0xff]  ;;  %v232_v45 = vld [vmem:[#allocation9 + $0x20] sm:$0xff]  ;;  %v231_v46 = vld [vmem:[#allocation9 + $0x18] sm:$0xff] }
  0x23   :  { %208 = vmatpush.msra.mxu1 %v189_v17  ;;  %246 = vmatpush.msra.mxu2 %v241_v36  ;;  %v330_v47 = vld [vmem:[%s557_s2] ss:$0 sm:$0xff]  ;;  %v229_v49 = vld [vmem:[#allocation9 + $0x8] sm:$0xff]  ;;  %v228_v52 = vld [vmem:[#allocation9] sm:$0xff] }
  0x24   :  { %126 = vmatpush.msra.mxu0 %v105_v14  ;;  %315 = vmatpush.msra.mxu3 %v105_v14  ;;  %v230_v48 = vld [vmem:[#allocation9 + $0x10] sm:$0xff] }
  0x25   :  { %209 = vmatpush.msra.mxu1 %v188_v19  ;;  %247 = vmatpush.msra.mxu2 %v240_v37  ;;  %v331_v4 = vld [vmem:[%s559_s4] ss:$0 sm:$0xff] }
  0x26   :  { %127 = vmatpush.msra.mxu0 %v104_v16  ;;  %316 = vmatpush.msra.mxu3 %v104_v16 }
  0x27   :  { %210 = vmatpush.msra.mxu1 %v187_v21  ;;  %248 = vmatpush.msra.mxu2 %v239_v38 }
  0x28   :  { %128 = vmatpush.msra.mxu0 %v103_v18  ;;  %317 = vmatpush.msra.mxu3 %v103_v18 }
  0x29   :  { %211 = vmatpush.msra.mxu1 %v186_v23  ;;  %249 = vmatpush.msra.mxu2 %v238_v39 }
  0x2a   :  { %129 = vmatpush.msra.mxu0 %v102_v20  ;;  %318 = vmatpush.msra.mxu3 %v102_v20 }
  0x2b   :  { %212 = vmatpush.msra.mxu1 %v185_v25  ;;  %250 = vmatpush.msra.mxu2 %v237_v40 }
  0x2c   :  { %130 = vmatpush.msra.mxu0 %v101_v22  ;;  %319 = vmatpush.msra.mxu3 %v101_v22 }
  0x2d   :  { %213 = vmatpush.msra.mxu1 %v184_v27  ;;  %251 = vmatpush.msra.mxu2 %v236_v41 }
  0x2e   :  { %131 = vmatpush.msra.mxu0 %v100_v24  ;;  %320 = vmatpush.msra.mxu3 %v100_v24 }
  0x2f   :  { %214 = vmatpush.msra.mxu1 %v183_v31  ;;  %252 = vmatpush.msra.mxu2 %v235_v42 }
  0x30   :  { %132 = vmatpush.msra.mxu0 %v99_v26  ;;  %321 = vmatpush.msra.mxu3 %v99_v26  ;;  %v332_v26 = vld [vmem:[%s561_s6] ss:$0 sm:$0xff] }
  0x31   :  { %215 = vmatpush.msra.mxu1 %v182_v32  ;;  %253 = vmatpush.msra.mxu2 %v234_v43 }
  0x32   :  { %133 = vmatpush.msra.mxu0 %v98_v28  ;;  %322 = vmatpush.msra.mxu3 %v98_v28 }
  0x33   :  { %134 = vmatmul.f32.vlgmr.msra.gmra.mxu0 %v96_v29  ;;  %137 = vmatmul.f32.vlgmr.msra.gmra.mxu3 %v97_v30 }
  0x34   :  { %216 = vmatpush.msra.mxu1 %v181_v33  ;;  %254 = vmatpush.msra.mxu2 %v233_v44 }
  0x35   :  { %217 = vmatmul.f32.vlgmr.msra.gmra.mxu1 %v96_v29 }
  0x36   :  { %255 = vmatpush.msra.mxu2 %v232_v45 }
  0x38   :  { %256 = vmatpush.msra.mxu2 %v231_v46 }
  0x3a   :  { %257 = vmatpush.msra.mxu2 %v230_v48 }
  0x3c   :  { %258 = vmatpush.msra.mxu2 %v229_v49 }
  0x3d   :  { %220 = vmatmul.f32.gmra.mxu1 %v97_v30 }
  0x3e   :  { %259 = vmatpush.msra.mxu2 %v228_v52 }
  0xb0   :  { %v135_v50 = vpop.f32.mrf.mxu0 }
  0xb1   :  { %v136_v51 = vadd.f32 %v330_v47, %v135_v50 }
  0xb2   :  { %v218_v1 = vpop.f32.mrf.mxu1 }
  0xb3   :  { %v305_v53 = vmul.f32 -1.442695, %v136_v51  ;;  %v219_v11 = vadd.f32 %v331_v4, %v218_v1 }
  0xb5   :  { %333 = vpow2.f32 %v305_v53 }
  0xb6   :  { %v138_v54 = vpop.f32.mrf.mxu3 }
  0xb7   :  { %v139_v55 = vadd.f32 %v330_v47, %v138_v54 }
  0xb9   :  { %v306_v56 = vmul.f32 -1.442695, %v139_v55 }
  0xba   :  { %v221_v20 = vpop.f32.mrf.mxu1 }
  0xbb   :  { %v334_v57 = vpop.eup %333  ;;  %335 = vpow2.f32 %v306_v56  ;;  %v222_v24 = vadd.f32 %v331_v4, %v221_v20 }
  0xbc   :  { %v147_v58 = vadd.f32 1.0, %v334_v57 }
  0xbe   :  { %337 = vrcp.f32 %v147_v58  ;;  %v160_v0 = vand.u32 2147483648, %v147_v58  ;;  %v158_v3 = vand.u32 2147483647, %v147_v58  ;;  %vm154_vm1 = vweird.f32 %v147_v58 }
  0xc0   :  { %v161_v8 = vor.u32 1.1754944e-38, %v160_v0  ;;  %vm159_vm3 = vcmp.eq.f32.partialorder %v158_v3, 8.507059e+37 }
  0xc1   :  { %v336_v59 = vpop.eup %335 }
  0xc2   :  { %v148_v60 = vadd.f32 1.0, %v336_v59 }
  0xc4   :  { %v338_v61 = vpop.eup %337  ;;  %339 = vrcp.f32 %v148_v60  ;;  %v175_v13 = vand.u32 2147483648, %v148_v60  ;;  %v173_v16 = vand.u32 2147483647, %v148_v60  ;;  %vm169_vm5 = vweird.f32 %v148_v60 }
  0xc5   :  { %v150_v62 = vmul.f32 %v338_v61, %v147_v58  ;;  %vm155_vm0 = vweird.f32 %v338_v61 }
  0xc6   :  { %vm156_vm2 = vmor %vm154_vm1, %vm155_vm0  ;;  %v176_v19 = vor.u32 1.1754944e-38, %v175_v13  ;;  %vm174_vm7 = vcmp.eq.f32.partialorder %v173_v16, 8.507059e+37 }
  0xc7   :  { %v151_v63 = vsub.f32 1.0, %v150_v62 }
  0xc9   :  { %v152_v2 = vmul.f32 %v338_v61, %v151_v63 }
  0xca   :  { %v340_v5 = vpop.eup %339 }
  0xcb   :  { %v153_v6 = vadd.f32 %v338_v61, %v152_v2  ;;  %v165_v7 = vmul.f32 %v340_v5, %v148_v60  ;;  %vm170_vm4 = vweird.f32 %v340_v5 }
  0xcc   :  { %vm171_vm6 = vmor %vm169_vm5, %vm170_vm4 }
  0xcd   :  { %v157_v9 = vsel %vm156_vm2, %v338_v61, %v153_v6  ;;  %v166_v10 = vsub.f32 1.0, %v165_v7 }
  0xce   :  { %v162_v12 = vsel %vm159_vm3, %v161_v8, %v157_v9 }
  0xcf   :  { %v179_v14 = vmul.f32 %v162_v12, %v136_v51  ;;  %v167_v15 = vmul.f32 %v340_v5, %v166_v10 }
  0xd1   :  { %v168_v17 = vadd.f32 %v340_v5, %v167_v15  ;;  %v224_v18 = vmul.f32 %v219_v11, %v179_v14 }
  0xd3   :  { %v172_v21 = vsel %vm171_vm6, %v340_v5, %v168_v17  ;;  %260 = vmatmul.f32.vlgmr.msra.gmra.mxu2 %v224_v18 }
  0xd4   :  { %v177_v22 = vsel %vm174_vm7, %v176_v19, %v172_v21 }
  0xd5   :  { %v180_v23 = vmul.f32 %v177_v22, %v139_v55 }
  0xd7   :  { %v225_v25 = vmul.f32 %v222_v24, %v180_v23 }
  0xdb   :  { %263 = vmatmul.f32.gmra.mxu2 %v225_v25 }
 0x156   :  { %v261_v27 = vpop.f32.mrf.mxu2 }
 0x157   :  { %v280_v28 = vadd.f32 %v332_v26, %v261_v27 }
 0x159   :  { %282 = vst [vmem:[#allocation11] sm:$0xff] %v280_v28 }
 0x15e   :  { %v264_v29 = vpop.f32.mrf.mxu2 }
 0x15f   :  { %v281_v30 = vadd.f32 %v332_v26, %v264_v29 }
 0x161   :  { %283 = vst [vmem:[#allocation11 + $0x8] sm:$0xff] %v281_v30 }
 0x162   :  { %296 = dma.vmem_to_hbm [thread:$0]  %s289_s24, 256, %s291_s27, [#allocation5], %s470_s9, %s470_s9, %s471_s10  }
 0x163   :  { %467 = dma.done.wait [#allocation5], 256  }
 0x164   :  { %468 = vsyncadd [#allocation5], 4294967040 }
 0x165   :  { %301 = vsyncpa [#allocation4], 1 }
 0x166   :  { %302 = vsyncpa [#allocation7], 1 }
 0x167   :  { %303 = vsyncpa [#allocation10], 1 }
 0x168   :  { %304 = vsyncpa [#allocation5], 1 }

</bundles_post_ra>
